<compile_context>
chip_gen: v5e
topology: v5e:2x2
jax: 0.10.0
libtpu: 0.0.40
codegen_flags: <defaults>
</compile_context>

<pallas_src>
import jax
import jax.numpy as jnp
from jax.experimental import pallas as pl
from jax.experimental.pallas import tpu as pltpu


def _dfl_kernel(pred_ref, label_ref, loss_ref):
    pred = pred_ref[...].astype(jnp.float32)      # (C, T): C on sublanes, rows on lanes
    label = label_ref[...].astype(jnp.float32)    # (1, T)

    # Integer bin indices (truncation toward zero == torch .long() for labels >= 0)
    dis_left = label.astype(jnp.int32)            # (1, T)
    dis_left_f = dis_left.astype(jnp.float32)
    w_left = (dis_left_f + 1.0) - label           # (1, T)
    w_right = label - dis_left_f                  # (1, T)

    # Numerically-stable logsumexp over the class axis (sublane reduction, C rows).
    m = jnp.max(pred, axis=0, keepdims=True)                        # (1, T)
    lse = m + jnp.log(jnp.sum(jnp.exp(pred - m), axis=0,
                              keepdims=True))                       # (1, T)

    # Fused gather: w_left + w_right == 1 exactly, so
    #   loss = lse - (w_left * pred[dis_left] + w_right * pred[dis_left + 1])
    c, t = pred.shape
    row = jax.lax.broadcasted_iota(jnp.int32, (c, t), 0)            # (C, T) sublane ids
    w = jnp.where(row == dis_left, w_left,
                  jnp.where(row == dis_left + 1, w_right, 0.0))     # (C, T)
    sel = jnp.sum(pred * w, axis=0, keepdims=True)                  # (1, T)

    loss_ref[...] = (lse - sel).astype(loss_ref.dtype)


def distribution_focal_loss(pred, label, *, lane_tile=8192):
    """pred: (N, C) float32/bfloat16, label: (N,) float. Returns loss: (N,) float32."""
    n, c = pred.shape

    # Lane-dense tiling: pick a 128-multiple tile, capped at the (lane-aligned) N.
    n_aligned = ((n + 127) // 128) * 128
    tile = max(128, min(((lane_tile + 127) // 128) * 128, n_aligned))
    num_tiles = pl.cdiv(n, tile)
    n_full = num_tiles * tile

    # Present pred as (C, N): N on the lane axis, C on sublanes.
    pred_t = jnp.transpose(pred, (1, 0))                            # (C, N)
    label_f = label.astype(jnp.float32)
    if n_full != n:
        pred_t = jnp.pad(pred_t, ((0, 0), (0, n_full - n)))
        label_f = jnp.pad(label_f, (0, n_full - n))
    label2d = label_f.reshape(1, n_full)

    loss2d = pl.pallas_call(
        _dfl_kernel,
        out_shape=jax.ShapeDtypeStruct((1, n_full), jnp.float32),
        grid_spec=pltpu.PrefetchScalarGridSpec(
            num_scalar_prefetch=0,
            grid=(num_tiles,),
            in_specs=[
                pl.BlockSpec((c, tile), lambda i: (0, i)),
                pl.BlockSpec((1, tile), lambda i: (0, i)),
            ],
            out_specs=pl.BlockSpec((1, tile), lambda i: (0, i)),
        ),
        compiler_params=pltpu.CompilerParams(
            dimension_semantics=("parallel",)),
    )(pred_t, label2d)
    return loss2d.reshape(n_full)[:n]


def _reference(pred, label):
    # Pure-JAX reference for sanity checking.
    dis_left = label.astype(jnp.int32)
    dis_left_f = dis_left.astype(jnp.float32)
    w_left = (dis_left_f + 1.0) - label
    w_right = label - dis_left_f
    logp = jax.nn.log_softmax(pred.astype(jnp.float32), axis=-1)
    ce_l = -jnp.take_along_axis(logp, dis_left[:, None], axis=-1)[:, 0]
    ce_r = -jnp.take_along_axis(logp, dis_left[:, None] + 1, axis=-1)[:, 0]
    return ce_l * w_left + ce_r * w_right


if __name__ == "__main__":
    key = jax.random.PRNGKey(0)
    k1, k2 = jax.random.split(key)

    N, C = 256, 8  # C = n+1 bins of the integral set {0, ..., n}
    pred = jax.random.normal(k1, (N, C), dtype=jnp.float32)
    # Target distances in [0, C-2) so dis_right = dis_left + 1 stays in range.
    label = jax.random.uniform(k2, (N,), dtype=jnp.float32,
                               minval=0.0, maxval=float(C - 1) - 1e-3)

    loss = distribution_focal_loss(pred, label)
    loss = jax.block_until_ready(loss)

    ref = _reference(pred, label)
    assert loss.shape == (N,)
    assert jnp.allclose(loss, ref, atol=1e-5, rtol=1e-5), (
        float(jnp.max(jnp.abs(loss - ref))))
    print("KERNEL_OK")
</pallas_src>

<mosaic_0001>
module attributes {stable_mosaic.version = 11 : i64} {
  func.func @_dfl_kernel(%arg0: i32, %arg1: memref<8x256xf32, #tpu.memory_space<vmem>>, %arg2: memref<1x256xf32, #tpu.memory_space<vmem>>, %arg3: memref<1x256xf32, #tpu.memory_space<vmem>>) attributes {dimension_semantics = [#tpu.dimension_semantics<parallel>], iteration_bounds = array<i64: 1>, scalar_prefetch = 0 : i64, scratch_operands = 0 : i64, tpu.core_type = #tpu.core_type<tc>, window_params = [{transform_indices = @transform_0, window_bounds = array<i64: 8, 256>}, {transform_indices = @transform_1, window_bounds = array<i64: 1, 256>}, {transform_indices = @transform_2, window_bounds = array<i64: 1, 256>}]} {
    %c0 = arith.constant 0 : index
    %c0_0 = arith.constant 0 : index
    %0 = vector.load %arg1[%c0, %c0_0] : memref<8x256xf32, #tpu.memory_space<vmem>>, vector<8x256xf32>
    %c0_1 = arith.constant 0 : index
    %c0_2 = arith.constant 0 : index
    %1 = vector.load %arg2[%c0_1, %c0_2] : memref<1x256xf32, #tpu.memory_space<vmem>>, vector<1x256xf32>
    %2 = arith.fptosi %1 : vector<1x256xf32> to vector<1x256xi32>
    %3 = arith.sitofp %2 : vector<1x256xi32> to vector<1x256xf32>
    %cst = arith.constant 1.000000e+00 : f32
    %4 = vector.broadcast %cst : f32 to vector<1x256xf32>
    %5 = arith.addf %3, %4 : vector<1x256xf32>
    %6 = arith.subf %5, %1 : vector<1x256xf32>
    %7 = arith.subf %1, %3 : vector<1x256xf32>
    %cst_3 = arith.constant dense<0xFF800000> : vector<256xf32>
    %8 = vector.multi_reduction <maximumf>, %0, %cst_3 [0] : vector<8x256xf32> to vector<256xf32>
    %9 = vector.shape_cast %8 : vector<256xf32> to vector<1x256xf32>
    %10 = vector.broadcast %9 : vector<1x256xf32> to vector<8x256xf32>
    %11 = arith.subf %0, %10 : vector<8x256xf32>
    %12 = math.exp %11 : vector<8x256xf32>
    %cst_4 = arith.constant dense<0.000000e+00> : vector<256xf32>
    %13 = vector.multi_reduction <add>, %12, %cst_4 [0] : vector<8x256xf32> to vector<256xf32>
    %14 = vector.shape_cast %13 : vector<256xf32> to vector<1x256xf32>
    %15 = math.log %14 : vector<1x256xf32>
    %16 = arith.addf %9, %15 : vector<1x256xf32>
    %17 = tpu.iota {dimensions = array<i32: 0>} : vector<8x256xi32>
    %18 = vector.broadcast %2 : vector<1x256xi32> to vector<8x256xi32>
    %19 = arith.cmpi eq, %17, %18 : vector<8x256xi32>
    %c1_i32 = arith.constant 1 : i32
    %20 = vector.broadcast %c1_i32 : i32 to vector<1x256xi32>
    %21 = arith.addi %2, %20 : vector<1x256xi32>
    %22 = vector.broadcast %21 : vector<1x256xi32> to vector<8x256xi32>
    %23 = arith.cmpi eq, %17, %22 : vector<8x256xi32>
    %cst_5 = arith.constant 0.000000e+00 : f32
    %24 = vector.shape_cast %7 : vector<1x256xf32> to vector<1x256xf32>
    %25 = vector.broadcast %24 : vector<1x256xf32> to vector<8x256xf32>
    %26 = vector.broadcast %cst_5 : f32 to vector<8x256xf32>
    %27 = arith.select %23, %25, %26 : vector<8x256xi1>, vector<8x256xf32>
    %28 = vector.shape_cast %6 : vector<1x256xf32> to vector<1x256xf32>
    %29 = vector.broadcast %28 : vector<1x256xf32> to vector<8x256xf32>
    %30 = arith.select %19, %29, %27 : vector<8x256xi1>, vector<8x256xf32>
    %31 = arith.mulf %0, %30 : vector<8x256xf32>
    %cst_6 = arith.constant dense<0.000000e+00> : vector<256xf32>
    %32 = vector.multi_reduction <add>, %31, %cst_6 [0] : vector<8x256xf32> to vector<256xf32>
    %33 = vector.shape_cast %32 : vector<256xf32> to vector<1x256xf32>
    %34 = arith.subf %16, %33 : vector<1x256xf32>
    %c0_7 = arith.constant 0 : index
    %c0_8 = arith.constant 0 : index
    %35 = vector.load %arg3[%c0_7, %c0_8] : memref<1x256xf32, #tpu.memory_space<vmem>>, vector<1x256xf32>
    tpu.vector_store %arg3[%c0_7, %c0_8], %34 {strides = array<i32>} : memref<1x256xf32, #tpu.memory_space<vmem>>, vector<1x256xf32>,
    return
  }
  func.func @transform_0(%arg0: i32) -> (i32, i32) {
    %c0_i32 = arith.constant 0 : i32
    %c0_i32_0 = arith.constant 0 : i32
    return %c0_i32, %arg0 : i32, i32
  }
  func.func @transform_1(%arg0: i32) -> (i32, i32) {
    %c0_i32 = arith.constant 0 : i32
    %c0_i32_0 = arith.constant 0 : i32
    return %c0_i32, %arg0 : i32, i32
  }
  func.func @transform_2(%arg0: i32) -> (i32, i32) {
    %c0_i32 = arith.constant 0 : i32
    %c0_i32_0 = arith.constant 0 : i32
    return %c0_i32, %arg0 : i32, i32
  }
}

</mosaic_0001>

<bundles_post_ra>
// kernel: tpu_custom_call.1
= control target key start
LH: loop header
LB: loop body
LE: loop exit
PB: predicated region body
PF: predicated region fallthrough
CT: control target
= control target key end

     0   :  { %7 = vsyncpa [#allocation3], 0  ;;  %s277_s0 = inlined_call_operand.hbm [shape: f32[8,256], index: 0, kind: input, shape index: {}]   ;;  %s278_s1 = inlined_call_operand.hbm [shape: f32[1,256], index: 1, kind: input, shape index: {}]   ;;  %s279_s2 = inlined_call_operand.hbm [shape: f32[1,256], index: 2, kind: output, shape index: {}]  }
   0x1   :  { %8 = vsyncpa [#allocation6], 0 }
   0x2   :  { %9 = vsyncpa [#allocation4], 0  ;;  %s15_s11 = sshll.u32 %s277_s0, 4  ;;  %s248_s12 = smov [#allocation2]   ;;  %s16_s11 = int_to_ptr.hbm [resolvable:$true] %s15_s11 }
   0x3   :  { %s17_s13 = sshll.u32 %s248_s12, 4  ;;  %s26_s16 = sshll.u32 %s278_s1, 4  ;;  %s18_s13 = int_to_ptr.vmem [resolvable:$true] %s17_s13  ;;  %s27_s16 = int_to_ptr.hbm [resolvable:$true] %s26_s16 }
   0x4   :  { %20 = dma.hbm_to_vmem [thread:$0]  %s16_s11, 256, %s18_s13, [#allocation3]  }
   0x5   :  { %s249_s17 = smov [#allocation5]  }
   0x6   :  { %s28_s18 = sshll.u32 %s249_s17, 4  ;;  %s29_s18 = int_to_ptr.vmem [resolvable:$true] %s28_s18 }
   0x7   :  { %31 = dma.hbm_to_vmem [thread:$0]  %s27_s16, 32, %s29_s18, [#allocation6]  }
   0x8   :  { %242 = dma.done.wait [#allocation3], 256  }
   0x9   :  { %243 = vsyncadd [#allocation3], 4294967040 }
   0xa   :  { %244 = dma.done.wait [#allocation6], 32  }
   0xb   :  { %245 = vsyncadd [#allocation6], 4294967264  ;;  %v40_v0 = vld [vmem:[#allocation2] sm:$0xff]  ;;  %v41_v1 = vld [vmem:[#allocation2 + $0x8] sm:$0xff]  ;;  %v84_v9 = vlaneseq  ;;  %s250_s0 = smov [#allocation7]   ;;  %s143_s21 = sshll.u32 %s279_s2, 4  ;;  %s144_s21 = int_to_ptr.hbm [resolvable:$true] %s143_s21 }
   0xc   :  { %v42_v2 = vld [vmem:[#allocation5] sm:$0x3]  ;;  %v48_v5 = vrot.slane %v40_v0, 4  ;;  %v54_v6 = vrot.slane %v41_v1, 4  ;;  %s141_s1 = sshll.u32 %s250_s0, 4  ;;  %vm128_vm5 = vcmask 1040384   ;;  %s142_s1 = int_to_ptr.vmem [resolvable:$true] %s141_s1 }
   0xd   :  { %vm154_vm0 = vcmp.lt.s32.totalorder %v42_v2, 0  ;;  %v155_v3 = vceil.f32 %v42_v2  ;;  %v156_v4 = vfloor.f32 %v42_v2  ;;  %v85_v16 = vshrl.u32 %v84_v9, 7 }
   0xe   :  { %v49_v8 = vmax.f32 %v40_v0, %v48_v5  ;;  %v55_v11 = vmax.f32 %v41_v1, %v54_v6  ;;  %vm133_vm6 = vcmp.lt.s32.totalorder %v84_v9, 256 }
   0xf   :  { %v157_v7 = vsel %vm154_vm0, %v155_v3, %v156_v4 }
  0x10   :  { %v158_v10 = vcvt.f32.s32 %v157_v7  ;;  %v50_v12 = vrot.slane %v49_v8, 2  ;;  %v56_v14 = vrot.slane %v55_v11, 2 }
  0x12   :  { %v44_v13 = vcvt.s32.f32 %v158_v10  ;;  %v51_v15 = vmax.f32 %v49_v8, %v50_v12  ;;  %v90_v17 = vadd.s32 1, %v158_v10  ;;  %v57_v20 = vmax.f32 %v55_v11, %v56_v14 }
  0x13   :  { %v86_v21 = vperm.slane %v158_v10, 0  ;;  %v87_v23 = vperm.slane %v158_v10, 1 }
  0x14   :  { %v45_v18 = vadd.f32 1.0, %v44_v13  ;;  %v47_v19 = vsub.f32 %v42_v2, %v44_v13  ;;  %v52_v22 = vrot.slane %v51_v15, 1  ;;  %v91_v24 = vperm.slane %v90_v17, 0 }
  0x15   :  { %v92_v25 = vperm.slane %v90_v17, 1  ;;  %v58_v27 = vrot.slane %v57_v20, 1  ;;  %vm88_vm3 = vcmp.eq.s32.totalorder %v85_v16, %v86_v21  ;;  %vm89_vm4 = vcmp.eq.s32.totalorder %v85_v16, %v87_v23 }
  0x16   :  { %v46_v26 = vsub.f32 %v45_v18, %v42_v2  ;;  %v96_v28 = vperm.slane %v47_v19, 0  ;;  %v97_v29 = vperm.slane %v47_v19, 1  ;;  %v53_v30 = vmax.f32 %v51_v15, %v52_v22 }
  0x17   :  { %vm93_vm1 = vcmp.eq.s32.totalorder %v85_v16, %v91_v24  ;;  %vm94_vm2 = vcmp.eq.s32.totalorder %v85_v16, %v92_v25  ;;  %v59_v31 = vmax.f32 %v57_v20, %v58_v27 }
  0x18   :  { %v60_v32 = vsub.f32 %v40_v0, %v53_v30  ;;  %v103_v33 = vperm.slane %v46_v26, 0  ;;  %v104_v34 = vperm.slane %v46_v26, 1  ;;  %v100_v36 = vsel %vm93_vm1, %v96_v28, 0.0 }
  0x19   :  { %v61_v35 = vsub.f32 %v41_v1, %v59_v31  ;;  %v101_v37 = vsel %vm94_vm2, %v97_v29, 0.0 }
  0x1a   :  { %v62_v38 = vmul.f32 1.442695, %v60_v32  ;;  %v107_v40 = vsel %vm88_vm3, %v103_v33, %v100_v36  ;;  %v108_v41 = vsel %vm89_vm4, %v104_v34, %v101_v37 }
  0x1b   :  { %v64_v39 = vmul.f32 1.442695, %v61_v35  ;;  %v109_v42 = vmul.f32 %v107_v40, %v40_v0  ;;  %v110_v43 = vmul.f32 %v108_v41, %v41_v1 }
  0x1c   :  { %162 = vpow2.f32 %v62_v38 }
  0x1d   :  { %164 = vpow2.f32 %v64_v39  ;;  %v111_v47 = vrot.slane %v109_v42, 4  ;;  %v117_v48 = vrot.slane %v110_v43, 4 }
  0x1f   :  { %v112_v53 = vadd.f32 %v111_v47, %v109_v42  ;;  %v118_v54 = vadd.f32 %v117_v48, %v110_v43 }
  0x21   :  { %v113_v59 = vrot.slane %v112_v53, 2  ;;  %v119_v60 = vrot.slane %v118_v54, 2 }
  0x22   :  { %v163_v44 = vpop.eup %162 }
  0x23   :  { %v165_v45 = vpop.eup %164  ;;  %v66_v46 = vrot.slane %v163_v44, 4  ;;  %v114_v0 = vadd.f32 %v113_v59, %v112_v53  ;;  %v120_v1 = vadd.f32 %v119_v60, %v118_v54 }
  0x24   :  { %v72_v49 = vrot.slane %v165_v45, 4 }
  0x25   :  { %v67_v50 = vadd.f32 %v163_v44, %v66_v46  ;;  %v115_v2 = vrot.slane %v114_v0, 1  ;;  %v121_v3 = vrot.slane %v120_v1, 1 }
  0x26   :  { %v73_v51 = vadd.f32 %v165_v45, %v72_v49 }
  0x27   :  { %v68_v52 = vrot.slane %v67_v50, 2  ;;  %v116_v8 = vadd.f32 %v115_v2, %v114_v0  ;;  %v122_v10 = vadd.f32 %v121_v3, %v120_v1 }
  0x28   :  { %v74_v55 = vrot.slane %v73_v51, 2 }
  0x29   :  { %v69_v56 = vadd.f32 %v68_v52, %v67_v50 }
  0x2a   :  { %v75_v57 = vadd.f32 %v74_v55, %v73_v51 }
  0x2b   :  { %v70_v58 = vrot.slane %v69_v56, 1 }
  0x2c   :  { %v76_v61 = vrot.slane %v75_v57, 1 }
  0x2d   :  { %v71_v62 = vadd.f32 %v70_v58, %v69_v56 }
  0x2e   :  { %v77_v63 = vadd.f32 %v76_v61, %v75_v57 }
  0x2f   :  { %166 = vlog2.f32 %v71_v62 }
  0x30   :  { %168 = vlog2.f32 %v77_v63 }
  0x35   :  { %v167_v4 = vpop.eup %166 }
  0x36   :  { %v169_v5 = vpop.eup %168  ;;  %v79_v6 = vmul.f32 0.6931472, %v167_v4 }
  0x37   :  { %v81_v7 = vmul.f32 0.6931472, %v169_v5 }
  0x38   :  { %v82_v11 = vadd.f32 %v79_v6, %v53_v30 }
  0x39   :  { %v83_v12 = vadd.f32 %v81_v7, %v59_v31 }
  0x3a   :  { %v123_v13 = vsub.f32 %v82_v11, %v116_v8 }
  0x3b   :  { %v124_v14 = vsub.f32 %v83_v12, %v122_v10 }
  0x3d   :  { %v127_v15 = vrot.slane %v124_v14, 7 }
  0x3f   :  { %v129_v16 = vsel %vm128_vm5, %v123_v13, %v127_v15 }
  0x40   :  { %135 = vst.msk [vmem:[#allocation7] sm:$0x3] %vm133_vm6, %v129_v16 }
  0x41   :  { %146 = dma.vmem_to_hbm [thread:$0]  %s142_s1, 32, %s144_s21, [#allocation4]  }
  0x42   :  { %246 = dma.done.wait [#allocation4], 32  }
  0x43   :  { %247 = vsyncadd [#allocation4], 4294967264 }
  0x44   :  { %151 = vsyncpa [#allocation3], 1 }
  0x45   :  { %152 = vsyncpa [#allocation6], 1 }
  0x46   :  { %153 = vsyncpa [#allocation4], 1 }

</bundles_post_ra>
